<compile_context>
chip_gen: v7x
topology: tpu7x:2x2x1
jax: 0.10.0
libtpu: 0.0.40
codegen_flags: <defaults>
</compile_context>

<pallas_src>
import jax
import jax.numpy as jnp
from jax.experimental import pallas as pl
from jax.experimental.pallas import tpu as pltpu

BN_EPS = 1e-5


# ---------------------------------------------------------------------------
# Kernels
# ---------------------------------------------------------------------------
def _stats_kernel(x_ref, w_ref, stats_ref, sum_acc, sq_acc):
    # x_ref:     (1, Cin, T)      NCHW slab (spatial tile on the lane axis)
    # w_ref:     (Cout, Cin)      1x1 conv weight
    # stats_ref: (1, 1, Cout, 2)  output block, written only at the last step
    # sum_acc:   (Cout, 1) f32    VMEM scratch accumulator (sum of z)
    # sq_acc:    (Cout, 1) f32    VMEM scratch accumulator (sum of z*z)
    t = pl.program_id(2)

    @pl.when(t == 0)
    def _():
        sum_acc[...] = jnp.zeros_like(sum_acc)
        sq_acc[...] = jnp.zeros_like(sq_acc)

    # No f32 upcast before the dot: MXU takes bf16/f32 natively; f32 accumulate
    # is preserved by preferred_element_type.
    z = jnp.dot(w_ref[...], x_ref[0], preferred_element_type=jnp.float32)  # (Cout, T)
    sum_acc[...] += jnp.sum(z, axis=1, keepdims=True)
    sq_acc[...] += jnp.sum(z * z, axis=1, keepdims=True)

    @pl.when(t == pl.num_programs(2) - 1)
    def _():
        stats_ref[...] = jnp.concatenate(
            [sum_acc[...], sq_acc[...]], axis=1)[None, None, :, :]


def _normalize_kernel(x_ref, w_ref, shift_ref, o_ref):
    # x_ref:     (1, Cin, T)
    # w_ref:     (Cout, Cin)   scale-folded weight: (gamma * inv_std) * w
    # shift_ref: (Cout, 1)     beta - mean * scale
    # o_ref:     (1, Cout, T)  lane-dense NCHW output tile
    z = jnp.dot(w_ref[...], x_ref[0], preferred_element_type=jnp.float32)  # (Cout, T)
    o_ref[0] = (z + shift_ref[...]).astype(o_ref.dtype)


# ---------------------------------------------------------------------------
# Tiling helpers
# ---------------------------------------------------------------------------
def _vmem_capacity_bytes():
    # Generation-aware: 64 MiB per TC on v7x, 128 MiB on v5e/v6e.  Fall back to
    # the smaller value if the query is unavailable.
    try:
        return int(pltpu.get_tpu_info().vmem_capacity_bytes)
    except Exception:
        return 64 * 1024 * 1024


def _choose_tile(hw, cin, cout, x_bytes, out_bytes, tile_budget_bytes):
    # Per spatial column (lane) VMEM cost for the worst pass (pass 2):
    #   x tile   : cin  * x_bytes   * 2  (double-buffered input)
    #   out tile : cout * out_bytes * 2  (double-buffered output)
    #   z interm : cout * 4              (f32 matmul result)
    per_lane = 2 * cin * x_bytes + 2 * cout * out_bytes + 4 * cout
    t = (tile_budget_bytes // per_lane) // 128 * 128
    hw_up = ((hw + 127) // 128) * 128           # smallest 128-multiple >= hw
    return max(128, min(t, hw_up))


# ---------------------------------------------------------------------------
# Wrapper
# ---------------------------------------------------------------------------
def branch0_forward(x_nchw, w, b, gamma, beta):
    """x_nchw: (N, Cin, H, W); w: (Cout, Cin) from a (Cout, Cin, 1, 1) conv kernel.

    NOTE: the conv bias `b` cancels under training-mode BatchNorm and is unused.
    """
    del b  # mathematically cancels: (y - mean(y)) is bias-independent

    N, Cin, H, W = x_nchw.shape
    Cout = w.shape[0]
    HW = H * W

    x_bytes = jnp.dtype(x_nchw.dtype).itemsize
    out_bytes = x_bytes

    vmem_cap = _vmem_capacity_bytes()
    tile_budget = vmem_cap // 4                 # leave headroom for scratch/vregs
    vmem_limit = int(vmem_cap * 0.7)

    T = _choose_tile(HW, Cin, Cout, x_bytes, out_bytes, tile_budget)
    n_tiles = pl.cdiv(HW, T)
    HW_pad = n_tiles * T

    x3 = x_nchw.reshape(N, Cin, HW)             # free view, stays NCHW-contiguous
    if HW_pad != HW:
        # Zero columns contribute exactly 0 to sum and sumsq (bias dropped) and
        # m stays N*HW, so the batch statistics are unchanged.
        x3 = jnp.pad(x3, ((0, 0), (0, 0), (0, HW_pad - HW)))

    # 2-way spatial split of the pass-1 reduction so both v7x TensorCores get
    # work when N alone can't be split evenly (N == 1 or odd N).
    S = 2 if (n_tiles % 2 == 0 and N % 2 == 1) else 1
    tiles_per_split = n_tiles // S

    # ---- Pass 1: per-(split, batch) partial sum / sum-of-squares of z = w @ x ----
    stats = pl.pallas_call(
        _stats_kernel,
        out_shape=jax.ShapeDtypeStruct((S, N, Cout, 2), jnp.float32),
        grid=(S, N, tiles_per_split),
        in_specs=[
            pl.BlockSpec((1, Cin, T),
                         lambda s, n, t: (n, 0, s * tiles_per_split + t)),
            pl.BlockSpec((Cout, Cin), lambda s, n, t: (0, 0)),
        ],
        out_specs=pl.BlockSpec((1, 1, Cout, 2), lambda s, n, t: (s, n, 0, 0)),
        scratch_shapes=[
            pltpu.VMEM((Cout, 1), jnp.float32),
            pltpu.VMEM((Cout, 1), jnp.float32),
        ],
        compiler_params=pltpu.CompilerParams(
            dimension_semantics=("parallel", "parallel", "arbitrary"),
            vmem_limit_bytes=vmem_limit),
    )(x3, w)

    # ---- Fold BN into per-channel scale/shift (tiny, plain JAX) ----
    # TODO(synk): E[z^2]-E[z]^2 in f32 can lose precision for very large N*HW
    # with |mean| >> std; a centered second pass would be more robust.
    m = jnp.float32(N * HW)
    total_sum = jnp.sum(stats[..., 0], axis=(0, 1))          # (Cout,)
    total_sq = jnp.sum(stats[..., 1], axis=(0, 1))           # (Cout,)
    mean = total_sum / m
    var = jnp.maximum(total_sq / m - mean * mean, 0.0)
    inv_std = jax.lax.rsqrt(var + BN_EPS)
    scale = gamma.astype(jnp.float32) * inv_std               # (Cout,)
    shift = (beta.astype(jnp.float32) - mean * scale).reshape(Cout, 1)
    # Fold scale into the weight (tiny Cout x Cin op outside the kernel) so the
    # hot loop is just dot + shift.
    w_scaled = (scale[:, None] * w.astype(jnp.float32)).astype(w.dtype)

    # ---- Pass 2: recompute z per tile with folded weight, add shift ----
    out3 = pl.pallas_call(
        _normalize_kernel,
        out_shape=jax.ShapeDtypeStruct((N, Cout, HW_pad), x_nchw.dtype),
        grid=(N, n_tiles),
        in_specs=[
            pl.BlockSpec((1, Cin, T), lambda n, t: (n, 0, t)),
            pl.BlockSpec((Cout, Cin), lambda n, t: (0, 0)),
            pl.BlockSpec((Cout, 1), lambda n, t: (0, 0)),
        ],
        out_specs=pl.BlockSpec((1, Cout, T), lambda n, t: (n, 0, t)),
        compiler_params=pltpu.CompilerParams(
            dimension_semantics=("parallel", "parallel"),
            vmem_limit_bytes=vmem_limit),
    )(x3, w_scaled, shift)

    if HW_pad != HW:
        out3 = out3[:, :, :HW]
    return out3.reshape(N, Cout, H, W)          # free view


if __name__ == "__main__":
    in_ch, out_ch = 4, 8
    N, H, W = 2, 16, 16

    key = jax.random.PRNGKey(0)
    kx, kw, kb = jax.random.split(key, 3)

    x = jax.random.normal(kx, (N, in_ch, H, W), dtype=jnp.float32)

    # Deterministic parameter init (shapes match nn.Conv2d(in_ch, out_ch, 1) + BN(out_ch))
    fan_in = in_ch  # kernel_size = 1
    bound = 1.0 / (fan_in ** 0.5)
    conv_w = jax.random.uniform(kw, (out_ch, in_ch), jnp.float32, -bound, bound)
    conv_b = jax.random.uniform(kb, (out_ch,), jnp.float32, -bound, bound)
    bn_gamma = jnp.ones((out_ch,), jnp.float32)
    bn_beta = jnp.zeros((out_ch,), jnp.float32)

    out = branch0_forward(x, conv_w, conv_b, bn_gamma, bn_beta)
    jax.block_until_ready(out)

    # sanity: shape check + reference check in plain JAX (with bias + training-mode BN)
    assert out.shape == (N, out_ch, H, W)
    y_ref = jnp.einsum("nchw,oc->nohw", x, conv_w) + conv_b[None, :, None, None]
    mean = jnp.mean(y_ref, axis=(0, 2, 3), keepdims=True)
    var = jnp.mean((y_ref - mean) ** 2, axis=(0, 2, 3), keepdims=True)
    ref = (y_ref - mean) / jnp.sqrt(var + BN_EPS) * bn_gamma[None, :, None, None] \
        + bn_beta[None, :, None, None]
    assert jnp.allclose(out, ref, atol=1e-4, rtol=1e-4)

    print("KERNEL_OK")
</pallas_src>

<mosaic_0001>
module attributes {stable_mosaic.version = 11 : i64} {
  func.func @_stats_kernel(%arg0: i32, %arg1: i32, %arg2: i32, %arg3: memref<1x4x256xf32, #tpu.memory_space<vmem>>, %arg4: memref<8x4xf32, #tpu.memory_space<vmem>>, %arg5: memref<1x1x8x2xf32, #tpu.memory_space<vmem>>, %arg6: memref<8x1xf32, #tpu.memory_space<vmem>>, %arg7: memref<8x1xf32, #tpu.memory_space<vmem>>) attributes {dimension_semantics = [#tpu.dimension_semantics<parallel>, #tpu.dimension_semantics<parallel>, #tpu.dimension_semantics<arbitrary>], iteration_bounds = array<i64: 1, 2, 1>, scalar_prefetch = 0 : i64, scratch_operands = 2 : i64, tpu.core_type = #tpu.core_type<tc>, window_params = [{transform_indices = @transform_0, window_bounds = array<i64: 1, 4, 256>}, {pipeline_mode = #tpu.pipeline_mode<synchronous>, transform_indices = @transform_1, window_bounds = array<i64: 8, 4>}, {transform_indices = @transform_2, window_bounds = array<i64: 1, 1, 8, 2>}]} {
    %c0_i32 = arith.constant 0 : i32
    %0 = arith.cmpi eq, %arg2, %c0_i32 : i32
    %1 = arith.extui %0 : i1 to i32
    %c0_i32_0 = arith.constant 0 : i32
    %2 = arith.cmpi ne, %1, %c0_i32_0 : i32
    scf.if %2 {
      %cst_17 = arith.constant 0.000000e+00 : f32
      %21 = vector.broadcast %cst_17 : f32 to vector<8x1xf32>
      %c0_18 = arith.constant 0 : index
      %c0_19 = arith.constant 0 : index
      %22 = vector.load %arg6[%c0_18, %c0_19] : memref<8x1xf32, #tpu.memory_space<vmem>>, vector<8x1xf32>
      tpu.vector_store %arg6[%c0_18, %c0_19], %21 {strides = array<i32>} : memref<8x1xf32, #tpu.memory_space<vmem>>, vector<8x1xf32>,
      %cst_20 = arith.constant 0.000000e+00 : f32
      %23 = vector.broadcast %cst_20 : f32 to vector<8x1xf32>
      %c0_21 = arith.constant 0 : index
      %c0_22 = arith.constant 0 : index
      %24 = vector.load %arg7[%c0_21, %c0_22] : memref<8x1xf32, #tpu.memory_space<vmem>>, vector<8x1xf32>
      tpu.vector_store %arg7[%c0_21, %c0_22], %23 {strides = array<i32>} : memref<8x1xf32, #tpu.memory_space<vmem>>, vector<8x1xf32>,
    } else {
    }
    %c0 = arith.constant 0 : index
    %c0_1 = arith.constant 0 : index
    %3 = vector.load %arg4[%c0, %c0_1] : memref<8x4xf32, #tpu.memory_space<vmem>>, vector<8x4xf32>
    %c0_2 = arith.constant 0 : index
    %c0_3 = arith.constant 0 : index
    %c0_4 = arith.constant 0 : index
    %4 = vector.load %arg3[%c0_2, %c0_3, %c0_4] : memref<1x4x256xf32, #tpu.memory_space<vmem>>, vector<1x4x256xf32>
    %5 = vector.shape_cast %4 : vector<1x4x256xf32> to vector<4x256xf32>
    %cst = arith.constant dense<0.000000e+00> : vector<8x256xf32>
    %6 = tpu.matmul %3, %5, %cst {dimension_numbers = #tpu.dot_dimension_numbers<[1], [0], [0], [1], [0, 0, 1, 1], [], []>} : vector<8x4xf32>, vector<4x256xf32>, vector<8x256xf32> -> vector<8x256xf32>
    %c0_5 = arith.constant 0 : index
    %c0_6 = arith.constant 0 : index
    %7 = vector.load %arg6[%c0_5, %c0_6] : memref<8x1xf32, #tpu.memory_space<vmem>>, vector<8x1xf32>
    %cst_7 = arith.constant dense<0.000000e+00> : vector<8xf32>
    %8 = vector.multi_reduction <add>, %6, %cst_7 [1] : vector<8x256xf32> to vector<8xf32>
    %9 = vector.shape_cast %8 : vector<8xf32> to vector<8x1xf32>
    %10 = arith.addf %7, %9 : vector<8x1xf32>
    %c0_8 = arith.constant 0 : index
    %c0_9 = arith.constant 0 : index
    %11 = vector.load %arg6[%c0_8, %c0_9] : memref<8x1xf32, #tpu.memory_space<vmem>>, vector<8x1xf32>
    tpu.vector_store %arg6[%c0_8, %c0_9], %10 {strides = array<i32>} : memref<8x1xf32, #tpu.memory_space<vmem>>, vector<8x1xf32>,
    %c0_10 = arith.constant 0 : index
    %c0_11 = arith.constant 0 : index
    %12 = vector.load %arg7[%c0_10, %c0_11] : memref<8x1xf32, #tpu.memory_space<vmem>>, vector<8x1xf32>
    %13 = arith.mulf %6, %6 : vector<8x256xf32>
    %cst_12 = arith.constant dense<0.000000e+00> : vector<8xf32>
    %14 = vector.multi_reduction <add>, %13, %cst_12 [1] : vector<8x256xf32> to vector<8xf32>
    %15 = vector.shape_cast %14 : vector<8xf32> to vector<8x1xf32>
    %16 = arith.addf %12, %15 : vector<8x1xf32>
    %c0_13 = arith.constant 0 : index
    %c0_14 = arith.constant 0 : index
    %17 = vector.load %arg7[%c0_13, %c0_14] : memref<8x1xf32, #tpu.memory_space<vmem>>, vector<8x1xf32>
    tpu.vector_store %arg7[%c0_13, %c0_14], %16 {strides = array<i32>} : memref<8x1xf32, #tpu.memory_space<vmem>>, vector<8x1xf32>,
    %c0_i32_15 = arith.constant 0 : i32
    %18 = arith.cmpi eq, %arg2, %c0_i32_15 : i32
    %19 = arith.extui %18 : i1 to i32
    %c0_i32_16 = arith.constant 0 : i32
    %20 = arith.cmpi ne, %19, %c0_i32_16 : i32
    scf.if %20 {
      %c0_17 = arith.constant 0 : index
      %c0_18 = arith.constant 0 : index
      %21 = vector.load %arg6[%c0_17, %c0_18] : memref<8x1xf32, #tpu.memory_space<vmem>>, vector<8x1xf32>
      %c0_19 = arith.constant 0 : index
      %c0_20 = arith.constant 0 : index
      %22 = vector.load %arg7[%c0_19, %c0_20] : memref<8x1xf32, #tpu.memory_space<vmem>>, vector<8x1xf32>
      %23 = tpu.concatenate %21, %22 in 1 : vector<8x1xf32>, vector<8x1xf32> -> vector<8x2xf32>
      %24 = vector.shape_cast %23 : vector<8x2xf32> to vector<1x1x8x2xf32>
      %c0_21 = arith.constant 0 : index
      %c0_22 = arith.constant 0 : index
      %c0_23 = arith.constant 0 : index
      %c0_24 = arith.constant 0 : index
      %25 = vector.load %arg5[%c0_21, %c0_22, %c0_23, %c0_24] : memref<1x1x8x2xf32, #tpu.memory_space<vmem>>, vector<1x1x8x2xf32>
      tpu.vector_store %arg5[%c0_21, %c0_22, %c0_23, %c0_24], %24 {strides = array<i32>} : memref<1x1x8x2xf32, #tpu.memory_space<vmem>>, vector<1x1x8x2xf32>,
    } else {
    }
    return
  }
  func.func @transform_0(%arg0: i32, %arg1: i32, %arg2: i32) -> (i32, i32, i32) {
    %c1_i32 = arith.constant 1 : i32
    %0 = arith.muli %arg0, %c1_i32 : i32
    %1 = arith.addi %0, %arg2 : i32
    %c0_i32 = arith.constant 0 : i32
    %c0_i32_0 = arith.constant 0 : i32
    return %arg1, %c0_i32, %1 : i32, i32, i32
  }
  func.func @transform_1(%arg0: i32, %arg1: i32, %arg2: i32) -> (i32, i32) {
    %c0_i32 = arith.constant 0 : i32
    %c0_i32_0 = arith.constant 0 : i32
    %c0_i32_1 = arith.constant 0 : i32
    return %c0_i32, %c0_i32_0 : i32, i32
  }
  func.func @transform_2(%arg0: i32, %arg1: i32, %arg2: i32) -> (i32, i32, i32, i32) {
    %c0_i32 = arith.constant 0 : i32
    %c0_i32_0 = arith.constant 0 : i32
    %c0_i32_1 = arith.constant 0 : i32
    return %arg0, %arg1, %c0_i32, %c0_i32_0 : i32, i32, i32, i32
  }
}

</mosaic_0001>

<bundles_post_ra>
// kernel: tpu_custom_call.1
= control target key start
LH: loop header
LB: loop body
LE: loop exit
PB: predicated region body
PF: predicated region fallthrough
CT: control target
= control target key end

     0   :  { %7 = vsyncpa [#allocation5], 0  ;;  %s719_s0 = inlined_call_operand.hbm [shape: f32[2,4,256], index: 0, kind: input, shape index: {}]   ;;  %s720_s1 = inlined_call_operand.vmem [shape: f32[8,4], index: 1, kind: input, shape index: {}]   ;;  %s721_s2 = inlined_call_operand.vmem [shape: f32[1,2,8,2], index: 2, kind: output, shape index: {}]  }
   0x1   :  { %9 = vsyncpa [#allocation5 + $0x1], 0  ;;  %s586_s9 = smov 0   ;;  %s588_s10 = smov 0  }
   0x2   :  { %s590_s11 = smov 0   ;;  %s592_s12 = smov 0  }
   0x3   :  { %s594_s13 = smov 0   ;;  %s596_s14 = smov 0  }
   0x4 LB: > { %s412_s15 = sadd.s32 4294967295, %s566_s14   ;;  %s30_s16 = sadd.s32 1, %s562_s13  ;;  %s566_s14 = sphi %s596_s14, %s15_s14   ;;  %s562_s13 = sphi %s594_s13, %s731_s13   ;;  %s558_s12 = sphi %s592_s12, %s730_s12   ;;  %s554_s11 = sphi %s590_s11, %s729_s11   ;;  %s550_s10 = sphi %s588_s10, %s728_s10   ;;  %s546_s9 = sphi %s586_s9, %s727_s9  }
   0x5   : > { %p32_p0 = scmp.ge.s32.totalorder %s30_s16, 2  ;;  %s45_s17 = sadd.s32 1, %s554_s11 }
   0x6   : > { %p52_p1 = scmp.ne.s32.totalorder %s554_s11, %s550_s10  ;;  %p53_p2 = scmp.eq.s32.totalorder %s566_s14, 0 }
   0x7   : > { %s733_s16 = smov (%p32_p0, %s30_s16), 0  ;;  %p58_p4 = scmp.ne.s32.totalorder %s550_s10, %s546_s9 }
   0x8   : > { %p622_p3 = por %p53_p2, %p52_p1  ;;  %s40_s19 = ssub.s32 %s562_s13, %s733_s16 }
   0x9   : > { %p59_p5 = scmp.eq.s32.totalorder %s412_s15, 0  ;;  %p43_p6 = scmp.eq.s32.totalorder %s40_s19, 0 }
   0xa   : > { %p434_p8 = scmp.lt.s32.totalorder %s566_s14, 2  ;;  %s134_s22 = sand.u32 1, %s554_s11  }
   0xb   : > { %p629_p7 = por %p59_p5, %p58_p4  ;;  %s427_s23 = sshll.u32 %s562_s13, 7 }
   0xc   : > { %s635_s21 = scalar_select %p43_p6, %s554_s11, %s45_s17  }
   0xd   : > { %s416_s24 = sshll.u32 %s134_s22, 3  ;;  %s642_s27 = scalar_lea.hbm %s719_s0, %s427_s23 }
   0xe   : > { %s138_s28 = scalar_lea.vmem [#allocation4], %s416_s24  ;;  %p646_p9 = pnand %p434_p8, %p622_p3 }
   0xf   : > { %s149_s29 = sshll.u32 %s138_s28, 4  ;;  %s135_s3 = scalar_lea.sflag [#allocation5], %s134_s22  ;;  %s650_s29 = int_to_ptr.vmem [resolvable:$true] %s149_s29 }
  0x10   : > { %s486_s4 = scalar_lea.hbm %s642_s27, 128  ;;  %p488_p13 = pneg %p646_p9 }
  0x11   : > { %p487_p12 = scmp.ne.s32.totalorder %s642_s27, %s486_s4  ;;  %s491_s7 = scalar_lea.hbm %s719_s0, 256 }
  0x12   : > { %p492_p2 = scmp.lt.u32.totalorder %s642_s27, %s719_s0  ;;  %p493_p3 = scmp.lt.u32.totalorder %s491_s7, %s486_s4 }
  0x13   : > { %p489_p0 = pnand %p488_p13, %p487_p12  ;;  %p495_p5 = scmp.lt.u32.totalorder %s486_s4, %s642_s27 }
  0x14   : > { %p494_p4 = por %p493_p3, %p492_p2 }
  0x15   : > { %p490_p1 = pneg %p489_p0 }
  0x16   : > { %p496_p6 = por %p495_p5, %p494_p4 }
  0x18   : > { %p497_p8 = pnand %p496_p6, %p490_p1 }
  0x1a   : > { %500 = shalt.err (!%p497_p8)
}
  0x1b   : > { %s501_s15 = scalar_lea.vmem %s650_s29, 128  ;;  %s568_s17 = smov [#allocation4]  }
  0x1c   : > { %p502_p12 = scmp.ne.s32.totalorder %s650_s29, %s501_s15  ;;  %s506_s18 = sshll.u32 %s568_s17, 4  ;;  %s507_s18 = int_to_ptr.vmem [resolvable:$false] %s506_s18 }
  0x1d   : > { %s508_s19 = scalar_lea.vmem %s507_s18, 256  ;;  %p509_p11 = scmp.lt.s32.totalorder %s650_s29, %s507_s18 }
  0x1e   : > { %p504_p0 = pnand %p502_p12, %p488_p13  ;;  %p510_p2 = scmp.lt.s32.totalorder %s508_s19, %s501_s15 }
  0x20   : > { %p505_p10 = pneg %p504_p0  ;;  %p511_p3 = por %p510_p2, %p509_p11 }
  0x22   : > { %p512_p4 = pnand %p511_p3, %p505_p10 }
  0x24   : > { %515 = shalt.err (!%p512_p4)
}
  0x25   : > { %433 = dma.hbm_to_vmem [thread:$0]  (!%p646_p9), %s642_s27, 128, %s650_s29, %s135_s3  }
  0x26   : > { %p725_p1 = scmp.lt.s32.totalorder %s566_s14, 3  ;;  %p726_p5 = scmp.ge.s32.totalorder %s566_s14, 1 }
  0x28   : > { %p155_p13 = pnand %p726_p5, %p725_p1 }
  0x29   : > { %s160_s22 = sand.u32 (!%p155_p13), 1, %s550_s10  }
  0x2a   : > { %158 = sbr.rel (%p155_p13) target bundleno = 541 (0x21d), region = 28  ;;  %s420_s23 = sshll.u32 (!%p155_p13), %s160_s22, 3 }
  0x2b   : > { %s161_s24 = scalar_lea.sflag (!%p155_p13), [#allocation5], %s160_s22  ;;  %s164_s25 = scalar_lea.vmem (!%p155_p13), [#allocation4], %s420_s23 }
  0x31   : > { %541 = dma.done.wait (%p629_p7), %s161_s24, 128  }
  0x32   : > { %543 = vsyncadd (%p629_p7), %s161_s24, 4294967168  ;;  %vm202_vm0 = vcmask 7168   ;;  %v569_v0 = vmov 0.0   ;;  %v206_v1 = vld [vmem:[%s164_s25] sm:$0xff]  ;;  %vm213_vm1 = vcmask 1043456   ;;  %v205_v3 = vld [vmem:[%s720_s1] sm:$0xff] }
  0x33   : > { %203 = vst.msk [vmem:[#allocation2] sm:$0xff] %vm202_vm0, %v569_v0  ;;  %204 = vst.msk [vmem:[#allocation3] sm:$0xff] %vm202_vm0, %v569_v0  ;;  %282 = vmatprep.mubr.f32.mxu0 %v569_v0  ;;  %v208_v2 = vcombine.high %v206_v1, %v206_v1  ;;  %vm209_vm2 = vcmask 31744   ;;  %s570_s20 = smov 1   ;;  %p192_p7 = scmp.lt.s32.totalorder %s558_s12, 1  ;;  %vm314_vm3 = vcmask 15360  }
  0x35   : > { %422 = vmatprep.subr.msk.mxu0 %vm213_vm1, %v208_v2  ;;  %s735_s12 = smov (!%p192_p7, %s558_s12), 1 }
  0x36   : > { %423 = vmatpush1.msk.msra.mxu0 %vm213_vm1, %v206_v1  ;;  %s421_s28 = sshll.u32 %s735_s12, 3 }
  0x37   : > { %424 = vmatmul.mubr.msk.f32.vlgmr.msra.gmra.mrb[0].mxu0 %vm209_vm2, %v205_v3  ;;  %s197_s3 = scalar_lea.vmem %s721_s2, %s421_s28 }
  0x3a   : > { %v296_v10 = vld [vmem:[#allocation3] sm:$0xff]  ;;  %v289_v13 = vld [vmem:[#allocation2] sm:$0xff] }
 0x10a   : > { %v284_v4 = vpop.f32.mrb[0].mxu0 }
 0x10b   : > { %v297_v5 = vmul.f32 %v284_v4, %v284_v4  ;;  %v286_v6 = vpop.f32.mrb[1].mxu0 }
 0x10c   : > { %v290_v7 = vadd.f32 %v286_v6, %v284_v4  ;;  %v298_v8 = vmul.f32 %v286_v6, %v286_v6 }
 0x10e   : > { %v299_v9 = vadd.f32 %v298_v8, %v297_v5 }
 0x110   : > { %300 = vadd.xlane.f32.xlu0 %v299_v9 }
 0x114   : > { %291 = vadd.xlane.f32.xlu0 %v290_v7 }
 0x19d   : > { %v301_v11 = vpop.xlane.xlu0 %300 }
 0x19e   : > { %v302_v12 = vadd.f32 %v301_v11, %v296_v10 }
 0x1a0   : > { %303 = vst.msk [vmem:[#allocation3] sm:$0xff] %vm202_vm0, %v302_v12 }
 0x1a1   : > { %v292_v14 = vpop.xlane.xlu0 %291 }
 0x1a2   : > { %v293_v15 = vadd.f32 %v292_v14, %v289_v13 }
 0x1a4   : > { %295 = vst.msk [vmem:[#allocation2] sm:$0xff] %vm202_vm0, %v293_v15 }
 0x1a7   : > { %v308_v16 = vld [vmem:[#allocation3] sm:$0xff] }
 0x1a8   : > { %310 = vrot.lane.b32.xlu1 %v308_v16, %s570_s20 }
 0x1ab   : > { %v307_v18 = vld [vmem:[#allocation2] sm:$0xff] }
 0x21a   : > { %v311_v17 = vpop.permute.xlu1 %310 }
 0x21b   : > { %v313_v19 = vsel %vm202_vm0, %v307_v18, %v311_v17 }
 0x21c   : > { %315 = vst.msk [vmem:[%s197_s3] sm:$0xff] %vm314_vm3, %v313_v19 }
 0x21d PF: > { %s15_s14 = sadd.s32 1, %s566_s14   ;;  %s727_s9 = smov %s550_s10 }
 0x21e   : > { %p12_p9 = scmp.ge.s32.totalorder %s15_s14, 4   ;;  %s728_s10 = smov %s554_s11 }
 0x21f   : > { %s729_s11 = smov %s635_s21  ;;  %s730_s12 = smov %s562_s13 }
 0x220   : > { %s731_s13 = smov %s733_s16  ;;  %14 = sbr.rel (!%p12_p9) target bundleno = 4 (0x4), region = 76 }
 0x227   :  { %343 = vsyncpa [#allocation5], 1 }
 0x228   :  { %345 = vsyncpa [#allocation5 + $0x1], 1 }

</bundles_post_ra>
